<compile_context>
chip_gen: v5e
topology: v5e:2x2
jax: 0.10.0
libtpu: 0.0.40
codegen_flags: <defaults>
</compile_context>

<pallas_src>
import math
import functools

import jax
import jax.numpy as jnp
from jax import lax
from jax.experimental import pallas as pl
from jax.experimental.pallas import tpu as pltpu

SIGMA = 1.0
COS_EPS = 1e-8       # torch CosineSimilarity eps (clamp on the norm *product*)
_ROW_EPS = 1e-4      # per-row norm clamp (sqrt of the product eps)
_TINY = 1e-30        # guards log2(0)*0 -> NaN
_NEG = -1.0e4        # "minus infinity" for padded rows/cols and scratch init:
                     # cos >= -1, and erf((1 - _NEG)/sqrt(2)) == 1.0 exactly in
                     # f32, so masked entries contribute ~1e-28 to the entropy.


def _round_up(x, m):
    return ((x + m - 1) // m) * m


def _entropy_kernel(ex_ref, ey_ref, h1_ref, h2_ref, c1_scr, c2_scr, h1_acc,
                    *, sigma, nx, ny, tm, tn):
    i = pl.program_id(0)            # Nx tile (outer)
    j = pl.program_id(1)            # Ny tile (inner -> reduction axis for c1)
    ni = pl.num_programs(0)
    nj = pl.num_programs(1)

    pad_rows = (nx % tm) != 0       # static Python bools: masking code is only
    pad_cols = (ny % tn) != 0       # traced in when padding actually exists

    inv_s_sqrt2 = 1.0 / (sigma * math.sqrt(2.0))

    # ---------------- init ----------------
    @pl.when((i == 0) & (j == 0))
    def _init_global():
        h1_acc[0] = jnp.float32(0.0)
        c2_scr[...] = jnp.full(c2_scr.shape, _NEG, jnp.float32)

    @pl.when(j == 0)
    def _init_c1():
        c1_scr[...] = jnp.full(c1_scr.shape, _NEG, jnp.float32)

    # Rows were pre-normalized in the wrapper, so cosine == plain dot product.
    # dot_general contracts the last dims of both operands -> MXU A @ B^T path,
    # no explicit transpose and no (tm,tn) divide/broadcast.
    cos = lax.dot_general(ex_ref[...], ey_ref[...], (((1,), (1,)), ((), ())),
                          preferred_element_type=jnp.float32)          # (tm, tn)

    def _update(c):
        # per-row running max (accumulated over the inner j axis)
        c1_scr[...] = jnp.maximum(c1_scr[...],
                                  jnp.max(c, axis=-1, keepdims=True))   # (tm, 1)
        # per-column running max (persists across the outer i axis)
        row = c2_scr[pl.ds(j, 1), :]                                    # (1, tn)
        c2_scr[pl.ds(j, 1), :] = jnp.maximum(
            row, jnp.max(c, axis=0, keepdims=True))

    if pad_rows or pad_cols:
        conds = []
        if pad_cols:
            conds.append(j == nj - 1)
        if pad_rows:
            conds.append(i == ni - 1)
        edge = conds[0]
        for c_ in conds[1:]:
            edge = jnp.logical_or(edge, c_)

        @pl.when(edge)
        def _masked_update():
            c = cos
            if pad_cols:   # padded ey columns must never win a max
                cid = j * tn + lax.broadcasted_iota(jnp.int32, (1, tn), 1)
                c = c + jnp.where(cid < ny, 0.0, _NEG).astype(jnp.float32)
            if pad_rows:   # padded ex rows must never win a max
                rid = i * tm + lax.broadcasted_iota(jnp.int32, (tm, 1), 0)
                c = c + jnp.where(rid < nx, 0.0, _NEG).astype(jnp.float32)
            _update(c)

        @pl.when(jnp.logical_not(edge))
        def _clean_update():
            _update(cos)
    else:
        _update(cos)

    def _neg_plogp_sum(c):
        # p = 1 - HalfNormal(sigma).cdf(1 - c); cdf(x) = erf(x / (sigma*sqrt(2)))
        p = 1.0 - lax.erf((1.0 - c) * inv_s_sqrt2)
        p = jnp.maximum(p, _TINY)       # masked/padded entries -> ~0 contribution
        return -jnp.sum(jnp.log2(p) * p)

    # ------- per-Nx-tile finalize: fold this tile's H1 partial (once per i) -------
    @pl.when(j == nj - 1)
    def _finish_row_tile():
        h1_acc[0] = h1_acc[0] + _neg_plogp_sum(c1_scr[...])

    # ------- global finalize: H2 from the full running column max (once) -------
    @pl.when((i == ni - 1) & (j == nj - 1))
    def _finish():
        h1_ref[0, 0] = h1_acc[0]
        h2_ref[0, 0] = _neg_plogp_sum(c2_scr[...])


def _normalize_rows(x):
    x = jnp.asarray(x, jnp.float32)
    n2 = jnp.sum(x * x, axis=-1, keepdims=True)
    return x * lax.rsqrt(jnp.maximum(n2, _ROW_EPS * _ROW_EPS))


def _pick_tiles(nx, ny, d, tm, tn):
    d_pad = _round_up(d, 128)

    def est(tm_, tn_):
        nj_ = _round_up(ny, tn_) // tn_
        inp = 2 * (tm_ + tn_) * d_pad * 4        # double-buffered input tiles
        cos = 2 * tm_ * tn_ * 4                  # cos tile (+ spill headroom)
        c1 = tm_ * 128 * 4                       # (tm,1) scratch, lane-padded
        c2 = _round_up(nj_, 8) * tn_ * 4         # persistent column-max scratch
        return inp + cos + c1 + c2

    user_tm, user_tn = tm is not None, tn is not None
    if tm is None:
        tm = 512 if nx >= 512 else _round_up(nx, 8)
    if tn is None:
        tn = 512 if ny >= 512 else _round_up(ny, 128)

    # Working-set budget that is safe on every generation
    # (v5e/v6e: 128 MiB physical VMEM, v7x: 64 MiB per TensorCore).
    budget = 40 * 1024 * 1024
    if not (user_tm and user_tn):
        while est(tm, tn) > budget and (tm > 8 or tn > 128):
            if (not user_tm) and (tm >= tn or user_tn) and tm > 8:
                tm = _round_up(max(8, tm // 2), 8)
            elif (not user_tn) and tn > 128:
                tn = _round_up(max(128, tn // 2), 128)
            else:
                break
    return tm, tn, est(tm, tn)


def entropy_dual_sided(ex, ey, sigma=SIGMA, tm=None, tn=None):
    """Pallas implementation of entropy.forward (dim=None). Returns (H1, H2)."""
    ex = jnp.asarray(ex)
    ey = jnp.asarray(ey)
    nx, d = ex.shape
    ny, d2 = ey.shape
    assert d == d2, "feature dims must match"

    # Put the smaller bag on the outer grid axis: the inner operand is
    # re-streamed from HBM once per outer tile, so "smaller outer" minimizes
    # total HBM reads (most important on v5e's ~820 GB/s HBM).
    swapped = False
    if tm is None and tn is None and nx > ny:
        ex, ey = ey, ex
        nx, ny = ny, nx
        swapped = True

    tm, tn, vmem_est = _pick_tiles(nx, ny, d, tm, tn)
    assert tm % 8 == 0 and tn % 128 == 0

    # Row normalization hoisted out of the hot loop (one fused XLA pass each).
    exn = _normalize_rows(ex)
    eyn = _normalize_rows(ey)

    nx_pad = _round_up(nx, tm)
    ny_pad = _round_up(ny, tn)
    if nx_pad != nx:
        exn = jnp.pad(exn, ((0, nx_pad - nx), (0, 0)))
    if ny_pad != ny:
        eyn = jnp.pad(eyn, ((0, ny_pad - ny), (0, 0)))

    ni = nx_pad // tm
    nj = ny_pad // tn

    kernel = functools.partial(_entropy_kernel, sigma=float(sigma),
                               nx=nx, ny=ny, tm=tm, tn=tn)

    # Size the scoped VMEM limit from the actual working set (with headroom),
    # capped well under v7x's 64 MiB physical VMEM.
    vmem_limit = int(min(max(vmem_est + (8 << 20), 32 << 20), 56 << 20))

    h1, h2 = pl.pallas_call(
        kernel,
        out_shape=(
            jax.ShapeDtypeStruct((1, 1), jnp.float32),
            jax.ShapeDtypeStruct((1, 1), jnp.float32),
        ),
        grid_spec=pltpu.PrefetchScalarGridSpec(
            num_scalar_prefetch=0,
            grid=(ni, nj),                                   # Ny tiles innermost
            in_specs=[
                pl.BlockSpec((tm, d), lambda i, j: (i, 0)),  # ex tile
                pl.BlockSpec((tn, d), lambda i, j: (j, 0)),  # ey tile (re-streamed)
            ],
            out_specs=(
                pl.BlockSpec(memory_space=pltpu.MemorySpace.SMEM),
                pl.BlockSpec(memory_space=pltpu.MemorySpace.SMEM),
            ),
            scratch_shapes=[
                pltpu.VMEM((tm, 1), jnp.float32),    # c1 running max (per Nx tile)
                pltpu.VMEM((nj, tn), jnp.float32),   # c2 running max, 2-D layout
                pltpu.SMEM((1,), jnp.float32),       # H1 accumulator
            ],
        ),
        compiler_params=pltpu.CompilerParams(
            # both grid axes carry running-max / running-sum state -> sequential
            dimension_semantics=("arbitrary", "arbitrary"),
            vmem_limit_bytes=vmem_limit,
        ),
    )(exn, eyn)

    h1, h2 = h1[0, 0], h2[0, 0]
    return (h2, h1) if swapped else (h1, h2)


def _reference(ex, ey, sigma=SIGMA):
    ex = ex.astype(jnp.float32)
    ey = ey.astype(jnp.float32)
    dots = ex @ ey.T
    denom = jnp.maximum(
        jnp.linalg.norm(ex, axis=-1, keepdims=True)
        * jnp.linalg.norm(ey, axis=-1, keepdims=True).T,
        COS_EPS,
    )
    cos = dots / denom
    c1 = cos.max(axis=-1)
    c2 = cos.max(axis=0)

    def tr(c):
        return 1.0 - jax.scipy.special.erf((1.0 - c) / (sigma * math.sqrt(2.0)))

    p1, p2 = tr(c1), tr(c2)
    return -(jnp.log2(p1) * p1).sum(), -(jnp.log2(p2) * p2).sum()


if __name__ == "__main__":
    key = jax.random.PRNGKey(0)
    k1, k2, k3, k4, k5, k6 = jax.random.split(key, 6)

    # Case 1: small bag-of-embeddings, single grid step (with column padding).
    ex = jax.random.normal(k1, (8, 32), dtype=jnp.float32)
    ey = jax.random.normal(k2, (16, 32), dtype=jnp.float32)
    h1, h2 = entropy_dual_sided(ex, ey)
    jax.block_until_ready((h1, h2))
    r1, r2 = _reference(ex, ey)
    assert jnp.allclose(h1, r1, rtol=1e-4, atol=1e-4), (h1, r1)
    assert jnp.allclose(h2, r2, rtol=1e-4, atol=1e-4), (h2, r2)

    # Case 2: forced-small tiles -> multi-tile grid with padding on both axes
    # (exercises running maxima, edge-tile masking and the 2-D c2 scratch).
    ex2 = jax.random.normal(k3, (40, 32), dtype=jnp.float32)
    ey2 = jax.random.normal(k4, (200, 32), dtype=jnp.float32)
    h1b, h2b = entropy_dual_sided(ex2, ey2, tm=16, tn=128)
    jax.block_until_ready((h1b, h2b))
    r1b, r2b = _reference(ex2, ey2)
    assert jnp.allclose(h1b, r1b, rtol=1e-4, atol=1e-4), (h1b, r1b)
    assert jnp.allclose(h2b, r2b, rtol=1e-4, atol=1e-4), (h2b, r2b)

    # Case 3: nx > ny -> exercises the operand swap (smaller bag on the outer
    # axis) plus multi-j-tile c2 accumulation with default tile selection.
    ex3 = jax.random.normal(k5, (600, 64), dtype=jnp.float32)
    ey3 = jax.random.normal(k6, (90, 64), dtype=jnp.float32)
    h1c, h2c = entropy_dual_sided(ex3, ey3)
    jax.block_until_ready((h1c, h2c))
    r1c, r2c = _reference(ex3, ey3)
    assert jnp.allclose(h1c, r1c, rtol=1e-4, atol=1e-4), (h1c, r1c)
    assert jnp.allclose(h2c, r2c, rtol=1e-4, atol=1e-4), (h2c, r2c)

    print("KERNEL_OK")
</pallas_src>

<mosaic_0001>
module attributes {stable_mosaic.version = 11 : i64} {
  func.func @_entropy_kernel(%arg0: i32, %arg1: i32, %arg2: memref<8x32xf32, #tpu.memory_space<vmem>>, %arg3: memref<128x32xf32, #tpu.memory_space<vmem>>, %arg4: memref<1x1xf32, #tpu.memory_space<smem>>, %arg5: memref<1x1xf32, #tpu.memory_space<smem>>, %arg6: memref<8x1xf32, #tpu.memory_space<vmem>>, %arg7: memref<1x128xf32, #tpu.memory_space<vmem>>, %arg8: memref<1xf32, #tpu.memory_space<smem>>) attributes {dimension_semantics = [#tpu.dimension_semantics<arbitrary>, #tpu.dimension_semantics<arbitrary>], iteration_bounds = array<i64: 1, 1>, scalar_prefetch = 0 : i64, scratch_operands = 3 : i64, tpu.core_type = #tpu.core_type<tc>, window_params = [{transform_indices = @transform_0, window_bounds = array<i64: 8, 32>}, {transform_indices = @transform_1, window_bounds = array<i64: 128, 32>}, {transform_indices = @transform_2, window_bounds = array<i64: 1, 1>}, {transform_indices = @transform_3, window_bounds = array<i64: 1, 1>}]} {
    %c0_i32 = arith.constant 0 : i32
    %0 = arith.cmpi eq, %arg0, %c0_i32 : i32
    %c0_i32_0 = arith.constant 0 : i32
    %1 = arith.cmpi eq, %arg1, %c0_i32_0 : i32
    %2 = arith.andi %0, %1 : i1
    %3 = arith.extui %2 : i1 to i32
    %c0_i32_1 = arith.constant 0 : i32
    %4 = arith.cmpi ne, %3, %c0_i32_1 : i32
    scf.if %4 {
      %cst_15 = arith.constant 0.000000e+00 : f32
      %c0_16 = arith.constant 0 : index
      %25 = memref.load %arg8[%c0_16] : memref<1xf32, #tpu.memory_space<smem>>
      memref.store %cst_15, %arg8[%c0_16] : memref<1xf32, #tpu.memory_space<smem>>
      %cst_17 = arith.constant -1.000000e+04 : f32
      %26 = vector.broadcast %cst_17 : f32 to vector<1x128xf32>
      %c0_18 = arith.constant 0 : index
      %c0_19 = arith.constant 0 : index
      %27 = vector.load %arg7[%c0_18, %c0_19] : memref<1x128xf32, #tpu.memory_space<vmem>>, vector<1x128xf32>
      tpu.vector_store %arg7[%c0_18, %c0_19], %26 {strides = array<i32>} : memref<1x128xf32, #tpu.memory_space<vmem>>, vector<1x128xf32>,
    } else {
    }
    %c0_i32_2 = arith.constant 0 : i32
    %5 = arith.cmpi eq, %arg1, %c0_i32_2 : i32
    %6 = arith.extui %5 : i1 to i32
    %c0_i32_3 = arith.constant 0 : i32
    %7 = arith.cmpi ne, %6, %c0_i32_3 : i32
    scf.if %7 {
      %cst_15 = arith.constant -1.000000e+04 : f32
      %25 = vector.broadcast %cst_15 : f32 to vector<8x1xf32>
      %c0_16 = arith.constant 0 : index
      %c0_17 = arith.constant 0 : index
      %26 = vector.load %arg6[%c0_16, %c0_17] : memref<8x1xf32, #tpu.memory_space<vmem>>, vector<8x1xf32>
      tpu.vector_store %arg6[%c0_16, %c0_17], %25 {strides = array<i32>} : memref<8x1xf32, #tpu.memory_space<vmem>>, vector<8x1xf32>,
    } else {
    }
    %c0 = arith.constant 0 : index
    %c0_4 = arith.constant 0 : index
    %8 = vector.load %arg2[%c0, %c0_4] : memref<8x32xf32, #tpu.memory_space<vmem>>, vector<8x32xf32>
    %c0_5 = arith.constant 0 : index
    %c0_6 = arith.constant 0 : index
    %9 = vector.load %arg3[%c0_5, %c0_6] : memref<128x32xf32, #tpu.memory_space<vmem>>, vector<128x32xf32>
    %cst = arith.constant dense<0.000000e+00> : vector<8x128xf32>
    %10 = tpu.matmul %8, %9, %cst {dimension_numbers = #tpu.dot_dimension_numbers<[1], [1], [0], [0], [0, 0, 1, 0], [], []>} : vector<8x32xf32>, vector<128x32xf32>, vector<8x128xf32> -> vector<8x128xf32>
    %c0_i32_7 = arith.constant 0 : i32
    %11 = arith.cmpi eq, %arg1, %c0_i32_7 : i32
    %12 = arith.extui %11 : i1 to i32
    %c0_i32_8 = arith.constant 0 : i32
    %13 = arith.cmpi ne, %12, %c0_i32_8 : i32
    scf.if %13 {
      %c128_i32 = arith.constant 128 : i32
      %25 = arith.muli %arg1, %c128_i32 : i32
      %26 = tpu.iota {dimensions = array<i32: 1>} : vector<1x128xi32>
      %27 = vector.broadcast %25 : i32 to vector<1x128xi32>
      %28 = arith.addi %27, %26 : vector<1x128xi32>
      %c16_i32 = arith.constant 16 : i32
      %29 = vector.broadcast %c16_i32 : i32 to vector<1x128xi32>
      %30 = arith.cmpi slt, %28, %29 : vector<1x128xi32>
      %cst_15 = arith.constant 0.000000e+00 : f32
      %cst_16 = arith.constant -1.000000e+04 : f32
      %31 = vector.broadcast %cst_15 : f32 to vector<1x128xf32>
      %32 = vector.broadcast %cst_16 : f32 to vector<1x128xf32>
      %33 = arith.select %30, %31, %32 : vector<1x128xi1>, vector<1x128xf32>
      %34 = vector.broadcast %33 : vector<1x128xf32> to vector<8x128xf32>
      %35 = arith.addf %10, %34 : vector<8x128xf32>
      %c0_17 = arith.constant 0 : index
      %c0_18 = arith.constant 0 : index
      %36 = vector.load %arg6[%c0_17, %c0_18] : memref<8x1xf32, #tpu.memory_space<vmem>>, vector<8x1xf32>
      %cst_19 = arith.constant dense<0xFF800000> : vector<8xf32>
      %37 = vector.multi_reduction <maximumf>, %35, %cst_19 [1] : vector<8x128xf32> to vector<8xf32>
      %38 = vector.shape_cast %37 : vector<8xf32> to vector<8x1xf32>
      %39 = arith.maximumf %36, %38 : vector<8x1xf32>
      %c0_20 = arith.constant 0 : index
      %c0_21 = arith.constant 0 : index
      %40 = vector.load %arg6[%c0_20, %c0_21] : memref<8x1xf32, #tpu.memory_space<vmem>>, vector<8x1xf32>
      tpu.vector_store %arg6[%c0_20, %c0_21], %39 {strides = array<i32>} : memref<8x1xf32, #tpu.memory_space<vmem>>, vector<8x1xf32>,
      %41 = arith.index_cast %arg1 : i32 to index
      %c0_22 = arith.constant 0 : index
      %42 = vector.load %arg7[%41, %c0_22] : memref<1x128xf32, #tpu.memory_space<vmem>>, vector<1x128xf32>
      %cst_23 = arith.constant dense<0xFF800000> : vector<128xf32>
      %43 = vector.multi_reduction <maximumf>, %35, %cst_23 [0] : vector<8x128xf32> to vector<128xf32>
      %44 = vector.shape_cast %43 : vector<128xf32> to vector<1x128xf32>
      %45 = arith.maximumf %42, %44 : vector<1x128xf32>
      %46 = arith.index_cast %arg1 : i32 to index
      %c0_24 = arith.constant 0 : index
      %47 = vector.load %arg7[%46, %c0_24] : memref<1x128xf32, #tpu.memory_space<vmem>>, vector<1x128xf32>
      tpu.vector_store %arg7[%46, %c0_24], %45 {strides = array<i32>} : memref<1x128xf32, #tpu.memory_space<vmem>>, vector<1x128xf32>,
    } else {
    }
    %true = arith.constant true
    %14 = arith.xori %11, %true : i1
    %15 = arith.extui %14 : i1 to i32
    %c0_i32_9 = arith.constant 0 : i32
    %16 = arith.cmpi ne, %15, %c0_i32_9 : i32
    scf.if %16 {
      %c0_15 = arith.constant 0 : index
      %c0_16 = arith.constant 0 : index
      %25 = vector.load %arg6[%c0_15, %c0_16] : memref<8x1xf32, #tpu.memory_space<vmem>>, vector<8x1xf32>
      %cst_17 = arith.constant dense<0xFF800000> : vector<8xf32>
      %26 = vector.multi_reduction <maximumf>, %10, %cst_17 [1] : vector<8x128xf32> to vector<8xf32>
      %27 = vector.shape_cast %26 : vector<8xf32> to vector<8x1xf32>
      %28 = arith.maximumf %25, %27 : vector<8x1xf32>
      %c0_18 = arith.constant 0 : index
      %c0_19 = arith.constant 0 : index
      %29 = vector.load %arg6[%c0_18, %c0_19] : memref<8x1xf32, #tpu.memory_space<vmem>>, vector<8x1xf32>
      tpu.vector_store %arg6[%c0_18, %c0_19], %28 {strides = array<i32>} : memref<8x1xf32, #tpu.memory_space<vmem>>, vector<8x1xf32>,
      %30 = arith.index_cast %arg1 : i32 to index
      %c0_20 = arith.constant 0 : index
      %31 = vector.load %arg7[%30, %c0_20] : memref<1x128xf32, #tpu.memory_space<vmem>>, vector<1x128xf32>
      %cst_21 = arith.constant dense<0xFF800000> : vector<128xf32>
      %32 = vector.multi_reduction <maximumf>, %10, %cst_21 [0] : vector<8x128xf32> to vector<128xf32>
      %33 = vector.shape_cast %32 : vector<128xf32> to vector<1x128xf32>
      %34 = arith.maximumf %31, %33 : vector<1x128xf32>
      %35 = arith.index_cast %arg1 : i32 to index
      %c0_22 = arith.constant 0 : index
      %36 = vector.load %arg7[%35, %c0_22] : memref<1x128xf32, #tpu.memory_space<vmem>>, vector<1x128xf32>
      tpu.vector_store %arg7[%35, %c0_22], %34 {strides = array<i32>} : memref<1x128xf32, #tpu.memory_space<vmem>>, vector<1x128xf32>,
    } else {
    }
    %c0_i32_10 = arith.constant 0 : i32
    %17 = arith.cmpi eq, %arg1, %c0_i32_10 : i32
    %18 = arith.extui %17 : i1 to i32
    %c0_i32_11 = arith.constant 0 : i32
    %19 = arith.cmpi ne, %18, %c0_i32_11 : i32
    scf.if %19 {
      %c0_15 = arith.constant 0 : index
      %25 = memref.load %arg8[%c0_15] : memref<1xf32, #tpu.memory_space<smem>>
      %c0_16 = arith.constant 0 : index
      %c0_17 = arith.constant 0 : index
      %26 = vector.load %arg6[%c0_16, %c0_17] : memref<8x1xf32, #tpu.memory_space<vmem>>, vector<8x1xf32>
      %cst_18 = arith.constant 1.000000e+00 : f32
      %27 = vector.broadcast %cst_18 : f32 to vector<8x1xf32>
      %28 = arith.subf %27, %26 : vector<8x1xf32>
      %cst_19 = arith.constant 0.707106769 : f32
      %29 = vector.broadcast %cst_19 : f32 to vector<8x1xf32>
      %30 = arith.mulf %28, %29 : vector<8x1xf32>
      %31 = math.erf %30 : vector<8x1xf32>
      %cst_20 = arith.constant 1.000000e+00 : f32
      %32 = vector.broadcast %cst_20 : f32 to vector<8x1xf32>
      %33 = arith.subf %32, %31 : vector<8x1xf32>
      %cst_21 = arith.constant 1.000000e-30 : f32
      %34 = vector.broadcast %cst_21 : f32 to vector<8x1xf32>
      %35 = arith.maximumf %33, %34 : vector<8x1xf32>
      %36 = math.log %35 : vector<8x1xf32>
      %cst_22 = arith.constant 2.000000e+00 : f32
      %37 = math.log %cst_22 : f32
      %38 = vector.broadcast %37 : f32 to vector<8x1xf32>
      %39 = arith.divf %36, %38 : vector<8x1xf32>
      %40 = arith.mulf %39, %35 : vector<8x1xf32>
      %41 = vector.shape_cast %40 : vector<8x1xf32> to vector<1x8x1xf32>
      %cst_23 = arith.constant dense<0.000000e+00> : vector<1xf32>
      %42 = vector.multi_reduction <add>, %41, %cst_23 [1, 2] : vector<1x8x1xf32> to vector<1xf32>
      %43 = vector.shape_cast %42 : vector<1xf32> to vector<1x1x1xf32>
      %44 = vector.extract %43[0, 0, 0] : f32 from vector<1x1x1xf32>
      %cst_24 = arith.constant 0.000000e+00 : f32
      %45 = arith.subf %cst_24, %44 : f32
      %46 = arith.addf %25, %45 : f32
      %c0_25 = arith.constant 0 : index
      %47 = memref.load %arg8[%c0_25] : memref<1xf32, #tpu.memory_space<smem>>
      memref.store %46, %arg8[%c0_25] : memref<1xf32, #tpu.memory_space<smem>>
    } else {
    }
    %c0_i32_12 = arith.constant 0 : i32
    %20 = arith.cmpi eq, %arg0, %c0_i32_12 : i32
    %c0_i32_13 = arith.constant 0 : i32
    %21 = arith.cmpi eq, %arg1, %c0_i32_13 : i32
    %22 = arith.andi %20, %21 : i1
    %23 = arith.extui %22 : i1 to i32
    %c0_i32_14 = arith.constant 0 : i32
    %24 = arith.cmpi ne, %23, %c0_i32_14 : i32
    scf.if %24 {
      %c0_15 = arith.constant 0 : index
      %25 = memref.load %arg8[%c0_15] : memref<1xf32, #tpu.memory_space<smem>>
      %c0_16 = arith.constant 0 : index
      %c0_17 = arith.constant 0 : index
      %26 = memref.load %arg4[%c0_16, %c0_17] : memref<1x1xf32, #tpu.memory_space<smem>>
      memref.store %25, %arg4[%c0_16, %c0_17] : memref<1x1xf32, #tpu.memory_space<smem>>
      %c0_18 = arith.constant 0 : index
      %c0_19 = arith.constant 0 : index
      %27 = vector.load %arg7[%c0_18, %c0_19] : memref<1x128xf32, #tpu.memory_space<vmem>>, vector<1x128xf32>
      %cst_20 = arith.constant 1.000000e+00 : f32
      %28 = vector.broadcast %cst_20 : f32 to vector<1x128xf32>
      %29 = arith.subf %28, %27 : vector<1x128xf32>
      %cst_21 = arith.constant 0.707106769 : f32
      %30 = vector.broadcast %cst_21 : f32 to vector<1x128xf32>
      %31 = arith.mulf %29, %30 : vector<1x128xf32>
      %32 = math.erf %31 : vector<1x128xf32>
      %cst_22 = arith.constant 1.000000e+00 : f32
      %33 = vector.broadcast %cst_22 : f32 to vector<1x128xf32>
      %34 = arith.subf %33, %32 : vector<1x128xf32>
      %cst_23 = arith.constant 1.000000e-30 : f32
      %35 = vector.broadcast %cst_23 : f32 to vector<1x128xf32>
      %36 = arith.maximumf %34, %35 : vector<1x128xf32>
      %37 = math.log %36 : vector<1x128xf32>
      %cst_24 = arith.constant 2.000000e+00 : f32
      %38 = math.log %cst_24 : f32
      %39 = vector.broadcast %38 : f32 to vector<1x128xf32>
      %40 = arith.divf %37, %39 : vector<1x128xf32>
      %41 = arith.mulf %40, %36 : vector<1x128xf32>
      %42 = vector.shape_cast %41 : vector<1x128xf32> to vector<1x1x128xf32>
      %cst_25 = arith.constant dense<0.000000e+00> : vector<1xf32>
      %43 = vector.multi_reduction <add>, %42, %cst_25 [1, 2] : vector<1x1x128xf32> to vector<1xf32>
      %44 = vector.shape_cast %43 : vector<1xf32> to vector<1x1x1xf32>
      %45 = vector.extract %44[0, 0, 0] : f32 from vector<1x1x1xf32>
      %cst_26 = arith.constant 0.000000e+00 : f32
      %46 = arith.subf %cst_26, %45 : f32
      %c0_27 = arith.constant 0 : index
      %c0_28 = arith.constant 0 : index
      %47 = memref.load %arg5[%c0_27, %c0_28] : memref<1x1xf32, #tpu.memory_space<smem>>
      memref.store %46, %arg5[%c0_27, %c0_28] : memref<1x1xf32, #tpu.memory_space<smem>>
    } else {
    }
    return
  }
  func.func @transform_0(%arg0: i32, %arg1: i32) -> (i32, i32) {
    %c0_i32 = arith.constant 0 : i32
    %c0_i32_0 = arith.constant 0 : i32
    return %arg0, %c0_i32 : i32, i32
  }
  func.func @transform_1(%arg0: i32, %arg1: i32) -> (i32, i32) {
    %c0_i32 = arith.constant 0 : i32
    %c0_i32_0 = arith.constant 0 : i32
    return %arg1, %c0_i32 : i32, i32
  }
  func.func @transform_2(%arg0: i32, %arg1: i32) -> (i32, i32) {
    %c0_i32 = arith.constant 0 : i32
    %c0_i32_0 = arith.constant 0 : i32
    %c0_i32_1 = arith.constant 0 : i32
    return %c0_i32, %c0_i32_0 : i32, i32
  }
  func.func @transform_3(%arg0: i32, %arg1: i32) -> (i32, i32) {
    %c0_i32 = arith.constant 0 : i32
    %c0_i32_0 = arith.constant 0 : i32
    %c0_i32_1 = arith.constant 0 : i32
    return %c0_i32, %c0_i32_0 : i32, i32
  }
}

</mosaic_0001>

<bundles_post_ra>
// kernel: tpu_custom_call.1
= control target key start
LH: loop header
LB: loop body
LE: loop exit
PB: predicated region body
PF: predicated region fallthrough
CT: control target
= control target key end

     0   :  { %9 = vsyncpa [#allocation6], 0  ;;  %vm46_vm0 = vcmask 261120   ;;  %s511_s0 = inlined_call_operand.vmem [shape: f32[8,32], index: 0, kind: input, shape index: {}]   ;;  %s512_s1 = inlined_call_operand.vmem [shape: f32[128,32], index: 1, kind: input, shape index: {}]   ;;  %s513_s2 = inlined_call_operand.hbm [shape: f32[1,1], index: 2, kind: output, shape index: {0}]   ;;  %s514_s3 = inlined_call_operand.hbm [shape: f32[1,1], index: 3, kind: output, shape index: {1}]  }
   0x1   :  { %v45_v0 = vld [vmem:[%s512_s1 + $0x78] sm:$0xff]  ;;  %v44_v1 = vld [vmem:[%s512_s1 + $0x70] sm:$0xff] }
   0x2   :  { %342 = vmatpush.xpose.msk.msra.mxu0 %vm46_vm0, %v45_v0 }
   0x3   :  { %10 = vsyncpa [#allocation8], 0  ;;  %v43_v2 = vld [vmem:[%s512_s1 + $0x68] sm:$0xff]  ;;  %v42_v3 = vld [vmem:[%s512_s1 + $0x60] sm:$0xff]  ;;  %v407_v9 = vmov -10000.0   ;;  %v122_v18 = vlaneseq  ;;  %vm27_vm2 = vcmask 7168  }
   0x4   :  { %v41_v4 = vld [vmem:[%s512_s1 + $0x58] sm:$0xff]  ;;  %v40_v5 = vld [vmem:[%s512_s1 + $0x50] sm:$0xff]  ;;  %v39_v6 = vld [vmem:[%s512_s1 + $0x48] sm:$0xff]  ;;  %23 = vst [vmem:[#allocation3] sm:$0x1] %v407_v9  ;;  %vm299_vm8 = vcmask 1040384  }
   0x5   :  { %v38_v7 = vld [vmem:[%s512_s1 + $0x40] sm:$0xff]  ;;  %v37_v8 = vld [vmem:[%s512_s1 + $0x38] sm:$0xff]  ;;  %v36_v10 = vld [vmem:[%s512_s1 + $0x30] sm:$0xff]  ;;  %v123_v19 = vand.u32 127, %v122_v18  ;;  %v408_v55 = vmov 0.6931472  }
   0x6   :  { %343 = vmatpush.xpose.msk.msra.mxu0 %vm46_vm0, %v44_v1  ;;  %v35_v11 = vld [vmem:[%s512_s1 + $0x28] sm:$0xff]  ;;  %v34_v12 = vld [vmem:[%s512_s1 + $0x20] sm:$0xff]  ;;  %v33_v13 = vld [vmem:[%s512_s1 + $0x18] sm:$0xff]  ;;  %28 = vst.msk [vmem:[#allocation2] sm:$0xff] %vm27_vm2, %v407_v9  ;;  %s318_s19 = sshll.u32 %s513_s2, 4  ;;  %s327_s22 = sshll.u32 %s514_s3, 4  ;;  %s319_s19 = int_to_ptr.hbm [resolvable:$true] %s318_s19  ;;  %s328_s22 = int_to_ptr.hbm [resolvable:$true] %s327_s22 }
   0x7   :  { %v32_v14 = vld [vmem:[%s512_s1 + $0x10] sm:$0xff]  ;;  %v31_v15 = vld [vmem:[%s512_s1 + $0x8] sm:$0xff]  ;;  %v30_v16 = vld [vmem:[%s512_s1] sm:$0xff]  ;;  %vm126_vm1 = vcmp.lt.s32.totalorder %v123_v19, 16  ;;  %s409_s27 = smov [#allocation5]   ;;  %s410_s28 = smov [#allocation7]  }
   0x8   :  { %v29_v17 = vld [vmem:[%s511_s0] sm:$0xff]  ;;  %v127_v20 = vsel %vm126_vm1, 0.0, %v407_v9 }
   0xa   :  { %344 = vmatpush.xpose.msk.msra.mxu0 %vm46_vm0, %v43_v2 }
   0xb   :  { %v135_v28 = vld [vmem:[#allocation3] sm:$0x1] }
   0xd   :  { %v129_v19 = vld [vmem:[#allocation2] sm:$0xff] }
   0xe   :  { %345 = vmatpush.xpose.msk.msra.mxu0 %vm46_vm0, %v42_v3 }
  0x12   :  { %346 = vmatpush.xpose.msk.msra.mxu0 %vm46_vm0, %v41_v4 }
  0x16   :  { %347 = vmatpush.xpose.msk.msra.mxu0 %vm46_vm0, %v40_v5 }
  0x1a   :  { %348 = vmatpush.xpose.msk.msra.mxu0 %vm46_vm0, %v39_v6 }
  0x1e   :  { %349 = vmatpush.xpose.msk.msra.mxu0 %vm46_vm0, %v38_v7 }
  0x22   :  { %350 = vmatpush.xpose.msk.msra.mxu0 %vm46_vm0, %v37_v8 }
  0x26   :  { %351 = vmatpush.xpose.msk.msra.mxu0 %vm46_vm0, %v36_v10 }
  0x2a   :  { %352 = vmatpush.xpose.msk.msra.mxu0 %vm46_vm0, %v35_v11 }
  0x2e   :  { %353 = vmatpush.xpose.msk.msra.mxu0 %vm46_vm0, %v34_v12 }
  0x32   :  { %354 = vmatpush.xpose.msk.msra.mxu0 %vm46_vm0, %v33_v13 }
  0x36   :  { %355 = vmatpush.xpose.msk.msra.mxu0 %vm46_vm0, %v32_v14 }
  0x3a   :  { %356 = vmatpush.xpose.msk.msra.mxu0 %vm46_vm0, %v31_v15 }
  0x3e   :  { %357 = vmatpush.xpose.msk.msra.mxu0 %vm46_vm0, %v30_v16 }
  0x41   :  { %358 = vmatmul.msk.f32.vlgmr.msra.gmra.mxu0 %vm46_vm0, %v29_v17 }
  0xbe   :  { %v115_v21 = vpop.f32.mrf.mxu0 }
  0xbf   :  { %v128_v22 = vadd.f32 %v127_v20, %v115_v21 }
  0xc1   :  { %v136_v23 = vrot.slane %v128_v22, 4  ;;  %130 = vmax.xlane.f32.xlu0 %v128_v22 }
  0xc3   :  { %v137_v24 = vmax.f32 %v128_v22, %v136_v23 }
  0xc5   :  { %v138_v25 = vrot.slane %v137_v24, 2 }
  0xc7   :  { %v139_v26 = vmax.f32 %v137_v24, %v138_v25 }
  0xc9   :  { %v140_v27 = vrot.slane %v139_v26, 1 }
  0xcb   :  { %v141_v29 = vmax.f32 %v139_v26, %v140_v27 }
  0xcd   :  { %v142_v30 = vmax.f32 %v135_v28, %v141_v29 }
  0xcf   :  { %143 = vst [vmem:[#allocation3] sm:$0x1] %v142_v30 }
  0xd6   :  { %v243_v31 = vld [vmem:[#allocation3] sm:$0x1] }
  0xd7   :  { %v244_v32 = vsub.f32 1.0, %v243_v31 }
  0xd9   :  { %v245_v33 = vmul.f32 0.70710677, %v244_v32 }
  0xdb   :  { %v246_v34 = vmul.f32 %v245_v33, %v245_v33 }
  0xdd   :  { %v247_v35 = vmin.f32 %v246_v34, 16.0 }
  0xdf   :  { %v248_v36 = vmul.f32 2.1237322e-06, %v247_v35  ;;  %v259_v37 = vmul.f32 3.8918573e-05, %v247_v35 }
  0xe1   :  { %v249_v38 = vadd.f32 0.00028619796, %v248_v36  ;;  %v260_v39 = vadd.f32 0.001143296, %v259_v37 }
  0xe3   :  { %v250_v40 = vmul.f32 %v249_v38, %v247_v35  ;;  %v261_v41 = vmul.f32 %v260_v39, %v247_v35 }
  0xe5   :  { %v262_v42 = vadd.f32 0.014752088, %v261_v41  ;;  %v251_v43 = vadd.f32 0.0036580483, %v250_v40 }
  0xe7   :  { %v263_v44 = vmul.f32 %v262_v42, %v247_v35  ;;  %v252_v46 = vmul.f32 %v251_v43, %v247_v35 }
  0xe9   :  { %v264_v45 = vadd.f32 0.112945676, %v263_v44  ;;  %v253_v49 = vadd.f32 0.05243302, %v252_v46 }
  0xeb   :  { %v265_v47 = vmul.f32 %v264_v45, %v247_v35  ;;  %v254_v52 = vmul.f32 %v253_v49, %v247_v35 }
  0xed   :  { %v266_v48 = vadd.f32 0.4994258, %v265_v47  ;;  %v255_v53 = vadd.f32 0.18741608, %v254_v52 }
  0xef   :  { %v267_v50 = vmul.f32 %v266_v48, %v247_v35  ;;  %v256_v56 = vmul.f32 %v255_v53, %v247_v35 }
  0xf1   :  { %v268_v51 = vadd.f32 1.0, %v267_v50  ;;  %v257_v60 = vadd.f32 1.1283791, %v256_v56 }
  0xf3   :  { %369 = vrcp.f32 %v268_v51  ;;  %v280_v59 = vand.u32 2147483648, %v268_v51  ;;  %v278_v62 = vand.u32 2147483647, %v268_v51  ;;  %vm274_vm4 = vweird.f32 %v268_v51 }
  0xf4   :  { %371 = vrcp.f32 %v408_v55  ;;  %v258_v3 = vmul.f32 %v257_v60, %v245_v33 }
  0xf5   :  { %v281_v1 = vor.u32 1.1754944e-38, %v280_v59  ;;  %vm279_vm6 = vcmp.eq.f32.partialorder %v278_v62, 8.507059e+37 }
  0xf9   :  { %v370_v54 = vpop.eup %369 }
  0xfa   :  { %v270_v57 = vmul.f32 %v370_v54, %v268_v51  ;;  %vm275_vm3 = vweird.f32 %v370_v54  ;;  %v372_v63 = vpop.eup %371 }
  0xfb   :  { %vm276_vm5 = vmor %vm274_vm4, %vm275_vm3  ;;  %v215_v2 = vmul.f32 0.6931472, %v372_v63  ;;  %vm219_vm7 = vweird.f32 %v372_v63 }
  0xfc   :  { %v271_v58 = vsub.f32 1.0, %v270_v57 }
  0xfd   :  { %v216_v7 = vsub.f32 1.0, %v215_v2 }
  0xfe   :  { %v272_v61 = vmul.f32 %v370_v54, %v271_v58 }
  0xff   :  { %v217_v10 = vmul.f32 %v372_v63, %v216_v7 }
 0x100   :  { %v273_v0 = vadd.f32 %v370_v54, %v272_v61 }
 0x101   :  { %v218_v12 = vadd.f32 %v372_v63, %v217_v10 }
 0x102   :  { %v277_v4 = vsel %vm276_vm5, %v370_v54, %v273_v0 }
 0x103   :  { %v282_v5 = vsel %vm279_vm6, %v281_v1, %v277_v4  ;;  %v220_v14 = vsel %vm219_vm7, %v372_v63, %v218_v12 }
 0x104   :  { %v283_v6 = vmul.f32 %v282_v5, %v258_v3 }
 0x106   :  { %v360_v8 = vclamps-f32 %v283_v6, 1.0 }
 0x108   :  { %v286_v9 = vsub.f32 1.0, %v360_v8 }
 0x10a   :  { %v287_v11 = vmax.f32 %v286_v9, 1e-30 }
 0x10c   :  { %373 = vlog2.f32 %v287_v11 }
 0x112   :  { %v374_v13 = vpop.eup %373 }
 0x113   :  { %v289_v15 = vmul.f32 0.6931472, %v374_v13 }
 0x115   :  { %v297_v16 = vmul.f32 %v289_v15, %v220_v14 }
 0x117   :  { %v298_v17 = vmul.f32 %v297_v16, %v287_v11 }
 0x119   :  { %v300_v18 = vsel %vm299_vm8, %v298_v17, 0.0 }
 0x11a   :  { %301 = vadd.xlane.f32.xlu1 %v300_v18 }
 0x134   :  { %v131_v20 = vpop.xlane.xlu0 %130 }
 0x135   :  { %v132_v21 = vmax.f32 %v129_v19, %v131_v20 }
 0x137   :  { %134 = vst.msk [vmem:[#allocation2] sm:$0xff] %vm27_vm2, %v132_v21 }
 0x13e   :  { %v167_v22 = vld [vmem:[#allocation2] sm:$0xff] }
 0x13f   :  { %v168_v23 = vsub.f32 1.0, %v167_v22 }
 0x141   :  { %v169_v24 = vmul.f32 0.70710677, %v168_v23 }
 0x143   :  { %v170_v25 = vmul.f32 %v169_v24, %v169_v24 }
 0x145   :  { %v171_v26 = vmin.f32 %v170_v25, 16.0 }
 0x147   :  { %v172_v27 = vmul.f32 2.1237322e-06, %v171_v26  ;;  %v183_v28 = vmul.f32 3.8918573e-05, %v171_v26 }
 0x149   :  { %v173_v29 = vadd.f32 0.00028619796, %v172_v27  ;;  %v184_v30 = vadd.f32 0.001143296, %v183_v28 }
 0x14b   :  { %v174_v31 = vmul.f32 %v173_v29, %v171_v26  ;;  %v185_v32 = vmul.f32 %v184_v30, %v171_v26 }
 0x14d   :  { %v186_v33 = vadd.f32 0.014752088, %v185_v32  ;;  %v175_v34 = vadd.f32 0.0036580483, %v174_v31 }
 0x14f   :  { %v187_v35 = vmul.f32 %v186_v33, %v171_v26  ;;  %v176_v37 = vmul.f32 %v175_v34, %v171_v26 }
 0x151   :  { %v188_v36 = vadd.f32 0.112945676, %v187_v35  ;;  %v177_v40 = vadd.f32 0.05243302, %v176_v37 }
 0x153   :  { %v189_v38 = vmul.f32 %v188_v36, %v171_v26  ;;  %v178_v43 = vmul.f32 %v177_v40, %v171_v26 }
 0x155   :  { %v190_v39 = vadd.f32 0.4994258, %v189_v38  ;;  %v179_v44 = vadd.f32 0.18741608, %v178_v43 }
 0x157   :  { %v191_v41 = vmul.f32 %v190_v39, %v171_v26  ;;  %v180_v46 = vmul.f32 %v179_v44, %v171_v26 }
 0x159   :  { %v192_v42 = vadd.f32 1.0, %v191_v41  ;;  %v181_v50 = vadd.f32 1.1283791, %v180_v46 }
 0x15b   :  { %375 = vrcp.f32 %v192_v42  ;;  %v204_v49 = vand.u32 2147483648, %v192_v42  ;;  %v202_v52 = vand.u32 2147483647, %v192_v42  ;;  %vm198_vm10 = vweird.f32 %v192_v42 }
 0x15c   :  { %v182_v55 = vmul.f32 %v181_v50, %v169_v24 }
 0x15d   :  { %v205_v54 = vor.u32 1.1754944e-38, %v204_v49  ;;  %vm203_vm12 = vcmp.eq.f32.partialorder %v202_v52, 8.507059e+37 }
 0x161   :  { %v376_v45 = vpop.eup %375 }
 0x162   :  { %v194_v47 = vmul.f32 %v376_v45, %v192_v42  ;;  %vm199_vm9 = vweird.f32 %v376_v45 }
 0x163   :  { %vm200_vm11 = vmor %vm198_vm10, %vm199_vm9 }
 0x164   :  { %v195_v48 = vsub.f32 1.0, %v194_v47 }
 0x166   :  { %v196_v51 = vmul.f32 %v376_v45, %v195_v48 }
 0x168   :  { %v197_v53 = vadd.f32 %v376_v45, %v196_v51 }
 0x16a   :  { %v201_v56 = vsel %vm200_vm11, %v376_v45, %v197_v53 }
 0x16b   :  { %v206_v57 = vsel %vm203_vm12, %v205_v54, %v201_v56 }
 0x16c   :  { %v207_v58 = vmul.f32 %v206_v57, %v182_v55 }
 0x16e   :  { %v359_v59 = vclamps-f32 %v207_v58, 1.0 }
 0x170   :  { %v210_v60 = vsub.f32 1.0, %v359_v59 }
 0x172   :  { %v211_v61 = vmax.f32 %v210_v60, 1e-30 }
 0x174   :  { %377 = vlog2.f32 %v211_v61 }
 0x17a   :  { %v378_v62 = vpop.eup %377 }
 0x17b   :  { %v213_v63 = vmul.f32 0.6931472, %v378_v62 }
 0x17d   :  { %v221_v0 = vmul.f32 %v220_v14, %v213_v63 }
 0x17f   :  { %v222_v1 = vmul.f32 %v221_v0, %v211_v61 }
 0x181   :  { %v224_v2 = vsel %vm27_vm2, %v222_v1, 0.0 }
 0x182   :  { %225 = vadd.xlane.f32.xlu0 %v224_v2 }
 0x18d   :  { %v302_v3 = vpop.xlane.xlu1 %301 }
 0x18e   :  { %v303_v4 = vrot.slane %v302_v3, 4 }
 0x190   :  { %v304_v5 = vadd.f32 %v303_v4, %v302_v3 }
 0x192   :  { %v305_v6 = vrot.slane %v304_v5, 2 }
 0x194   :  { %v306_v10 = vadd.f32 %v305_v6, %v304_v5 }
 0x196   :  { %v307_v13 = vrot.slane %v306_v10, 1 }
 0x198   :  { %v308_v17 = vadd.f32 %v307_v13, %v306_v10 }
 0x1f5   :  { %v226_v7 = vpop.xlane.xlu0 %225 }
 0x1f6   :  { %v227_v8 = vrot.slane %v226_v7, 4 }
 0x1f8   :  { %v228_v9 = vadd.f32 %v227_v8, %v226_v7 }
 0x1fa   :  { %v229_v11 = vrot.slane %v228_v9, 2 }
 0x1fc   :  { %v230_v12 = vadd.f32 %v229_v11, %v228_v9 }
 0x1fe   :  { %v231_v15 = vrot.slane %v230_v12, 1 }
 0x200   :  { %v232_v16 = vadd.f32 %v231_v15, %v230_v12 }
 0x202   :  { %361 = vpush %v232_v16 }
 0x203   :  { %363 = vpush %v308_v17 }
 0x233   :  { %s362_s23 = spop %361 }
 0x234   :  { %s234_s24 = ssub.f32 0.0, %s362_s23  ;;  %s364_s25 = spop %363 }
 0x235   :  { %s310_s26 = ssub.f32 0.0, %s364_s25 }
 0x236   :  { %242 = sst [smem:[#allocation5]] %s234_s24 }
 0x237   :  { %312 = sst [smem:[#allocation7]] %s310_s26 }
 0x238   :  { %321 = dma.smem_to_hbm %s409_s27, 16, %s319_s19, [#allocation6]  }
 0x239   :  { %330 = dma.smem_to_hbm %s410_s28, 16, %s328_s22, [#allocation8]  }
 0x23a   :  { %403 = dma.done.wait [#allocation6], 16  }
 0x23b   :  { %404 = vsyncadd [#allocation6], 4294967280 }
 0x23c   :  { %405 = dma.done.wait [#allocation8], 16  }
 0x23d   :  { %406 = vsyncadd [#allocation8], 4294967280 }
 0x23e   :  { %339 = sfence }
 0x23f   :  { %340 = vsyncpa [#allocation6], 1 }
 0x240   :  { %341 = vsyncpa [#allocation8], 1 }

</bundles_post_ra>
